<compile_context>
chip_gen: v6e
topology: v6e:2x2x1
jax: 0.10.0
libtpu: 0.0.40
codegen_flags: <defaults>
</compile_context>

<pallas_src>
import jax
import jax.numpy as jnp
from jax.experimental import pallas as pl
from jax.experimental.pallas import tpu as pltpu

IN_DIM, H1, H2, OUT_DIM = 100, 256, 512, 62
IN_PAD, OUT_PAD = 128, 128          # lane-aligned padded feature dims
MAX_BATCH_TILE = 1024               # sweet spot for large-B throughput (fits VMEM easily)


def generator_kernel(x_ref, w1_ref, b1_ref, w2_ref, b2_ref, w3_ref, b3_ref, o_ref):
    # Whole 3-layer MLP fused in one grid step: bf16 matmuls on the MXU with f32
    # accumulation, bias-add + ReLU on the VPU, everything resident in VMEM.
    x = x_ref[...]  # (batch_tile, 128) bf16
    h1 = jnp.dot(x, w1_ref[...], preferred_element_type=jnp.float32) + b1_ref[...]
    h1 = jnp.maximum(h1, 0.0).astype(jnp.bfloat16)
    h2 = jnp.dot(h1, w2_ref[...], preferred_element_type=jnp.float32) + b2_ref[...]
    h2 = jnp.maximum(h2, 0.0).astype(jnp.bfloat16)
    o = jnp.dot(h2, w3_ref[...], preferred_element_type=jnp.float32) + b3_ref[...]
    o_ref[...] = o.astype(o_ref.dtype)


def _round_up(n, m):
    return ((n + m - 1) // m) * m


def _pick_batch_tile(batch):
    """Adaptive batch tile:
      * tiny batches -> round up to 16 rows (bf16 sublane minimum), single step;
      * larger batches -> ~half the batch (so the grid has >= 2 steps and the
        'parallel' axis can shard across 2 TensorCores on v7x), capped at
        MAX_BATCH_TILE so per-step VMEM stays a few MiB."""
    b16 = _round_up(batch, 16)
    if b16 <= 32:
        return b16
    half = _round_up(b16 // 2, 16)
    return min(MAX_BATCH_TILE, half)


def prepare_params(params):
    """One-time layout prep (hoisted out of the per-call path): cast weights to bf16
    and zero-pad feature dims to 128 lanes. W stored (in, out); biases stay fp32."""
    w1, b1, w2, b2, w3, b3 = params
    w1p = jnp.pad(w1.astype(jnp.bfloat16), ((0, IN_PAD - IN_DIM), (0, 0)))
    w2p = w2.astype(jnp.bfloat16)
    w3p = jnp.pad(w3.astype(jnp.bfloat16), ((0, 0), (0, OUT_PAD - OUT_DIM)))
    b1p = jnp.reshape(b1, (1, H1)).astype(jnp.float32)
    b2p = jnp.reshape(b2, (1, H2)).astype(jnp.float32)
    b3p = jnp.pad(jnp.reshape(b3, (1, OUT_DIM)).astype(jnp.float32),
                  ((0, 0), (0, OUT_PAD - OUT_DIM)))
    return (w1p, b1p, w2p, b2p, w3p, b3p)


def generator_forward(x, prepared_params, *, batch_tile=None, out_dtype=jnp.float32):
    """x: (B, 100) fp32/bf16 latent vectors. prepared_params: output of prepare_params.
    Returns (B, 62) in out_dtype.  Call inside the same jit as the consumer so the
    input pad and output slice fuse with neighbouring ops."""
    w1p, b1p, w2p, b2p, w3p, b3p = prepared_params
    B = x.shape[0]
    if batch_tile is None:
        batch_tile = _pick_batch_tile(B)
    B_pad = pl.cdiv(B, batch_tile) * batch_tile

    # Single fused cast+pad (batch rows to B_pad, features 100 -> 128). Zero padding
    # keeps results bit-identical on the unpadded slice.
    xp = jnp.pad(x.astype(jnp.bfloat16),
                 ((0, B_pad - B), (0, IN_PAD - IN_DIM)))

    grid = (B_pad // batch_tile,)

    def rep(shape):
        # Weights / biases: same full block every grid step -> stay resident in VMEM.
        return pl.BlockSpec(shape, lambda i: (0,) * len(shape))

    out_padded = pl.pallas_call(
        generator_kernel,
        out_shape=jax.ShapeDtypeStruct((B_pad, OUT_PAD), out_dtype),
        grid_spec=pl.GridSpec(
            grid=grid,
            in_specs=[
                pl.BlockSpec((batch_tile, IN_PAD), lambda i: (i, 0)),  # x (streamed)
                rep((IN_PAD, H1)),    # w1 (bf16, K zero-padded)
                rep((1, H1)),         # b1 (f32)
                rep((H1, H2)),        # w2 (bf16)
                rep((1, H2)),         # b2 (f32)
                rep((H2, OUT_PAD)),   # w3 (bf16, cols zero-padded)
                rep((1, OUT_PAD)),    # b3 (f32, cols zero-padded)
            ],
            out_specs=pl.BlockSpec((batch_tile, OUT_PAD), lambda i: (i, 0)),
        ),
        compiler_params=pltpu.CompilerParams(
            # Batch tiles are independent -> shard across TensorCores (v7x megacore).
            dimension_semantics=("parallel",),
            # Explicit headroom so large tiles also compile under v5e's 16 MiB
            # scoped-VMEM default (footprint at tile=1024 is ~7 MiB).
            vmem_limit_bytes=32 * 1024 * 1024,
        ),
    )(xp, w1p, b1p, w2p, b2p, w3p, b3p)

    # When jitted together with the consumer this slice fuses (no extra HBM pass).
    return out_padded[:B, :OUT_DIM]


def init_params(key):
    """Deterministic init matching PyTorch Linear default: U(-1/sqrt(fan_in), 1/sqrt(fan_in))."""
    ks = jax.random.split(key, 6)

    def linear(kw, kb, fan_in, fan_out):
        bound = 1.0 / jnp.sqrt(fan_in)
        w = jax.random.uniform(kw, (fan_in, fan_out), jnp.float32, -bound, bound)
        b = jax.random.uniform(kb, (1, fan_out), jnp.float32, -bound, bound)
        return w, b

    w1, b1 = linear(ks[0], ks[1], IN_DIM, H1)
    w2, b2 = linear(ks[2], ks[3], H1, H2)
    w3, b3 = linear(ks[4], ks[5], H2, OUT_DIM)
    return (w1, b1, w2, b2, w3, b3)


def generator_reference(x, params):
    """fp32 reference (matches the PyTorch module semantics)."""
    w1, b1, w2, b2, w3, b3 = params
    h1 = jnp.maximum(x @ w1 + b1, 0.0)
    h2 = jnp.maximum(h1 @ w2 + b2, 0.0)
    return h2 @ w3 + b3


if __name__ == "__main__":
    key = jax.random.PRNGKey(0)
    k_params, k_x = jax.random.split(key)

    params = init_params(k_params)
    prepared = prepare_params(params)            # hoisted, one-time weight layout prep

    B = 8
    x = jax.random.normal(k_x, (B, IN_DIM), jnp.float32)  # latent noise vectors

    forward = jax.jit(generator_forward)         # pad / slice fuse inside the jit
    out = forward(x, prepared)
    out = jax.block_until_ready(out)

    ref = generator_reference(x, params)
    assert out.shape == (B, OUT_DIM), out.shape
    # bf16 matmul inputs with f32 accumulation -> use a bf16-appropriate tolerance.
    max_err = float(jnp.max(jnp.abs(out - ref)))
    assert max_err < 5e-2, f"mismatch vs fp32 reference: max abs err {max_err}"

    print("KERNEL_OK")
</pallas_src>

<mosaic_0001>
module attributes {stable_mosaic.version = 11 : i64} {
  func.func @generator_kernel(%arg0: i32, %arg1: memref<16x128xbf16, #tpu.memory_space<vmem>>, %arg2: memref<128x256xbf16, #tpu.memory_space<vmem>>, %arg3: memref<1x256xf32, #tpu.memory_space<vmem>>, %arg4: memref<256x512xbf16, #tpu.memory_space<vmem>>, %arg5: memref<1x512xf32, #tpu.memory_space<vmem>>, %arg6: memref<512x128xbf16, #tpu.memory_space<vmem>>, %arg7: memref<1x128xf32, #tpu.memory_space<vmem>>, %arg8: memref<16x128xf32, #tpu.memory_space<vmem>>) attributes {dimension_semantics = [#tpu.dimension_semantics<parallel>], iteration_bounds = array<i64: 1>, scalar_prefetch = 0 : i64, scratch_operands = 0 : i64, tpu.core_type = #tpu.core_type<tc>, window_params = [{transform_indices = @transform_0, window_bounds = array<i64: 16, 128>}, {pipeline_mode = #tpu.pipeline_mode<synchronous>, transform_indices = @transform_1, window_bounds = array<i64: 128, 256>}, {pipeline_mode = #tpu.pipeline_mode<synchronous>, transform_indices = @transform_2, window_bounds = array<i64: 1, 256>}, {pipeline_mode = #tpu.pipeline_mode<synchronous>, transform_indices = @transform_3, window_bounds = array<i64: 256, 512>}, {pipeline_mode = #tpu.pipeline_mode<synchronous>, transform_indices = @transform_4, window_bounds = array<i64: 1, 512>}, {pipeline_mode = #tpu.pipeline_mode<synchronous>, transform_indices = @transform_5, window_bounds = array<i64: 512, 128>}, {pipeline_mode = #tpu.pipeline_mode<synchronous>, transform_indices = @transform_6, window_bounds = array<i64: 1, 128>}, {transform_indices = @transform_7, window_bounds = array<i64: 16, 128>}]} {
    %c0 = arith.constant 0 : index
    %c0_0 = arith.constant 0 : index
    %0 = vector.load %arg1[%c0, %c0_0] : memref<16x128xbf16, #tpu.memory_space<vmem>>, vector<16x128xbf16>
    %c0_1 = arith.constant 0 : index
    %c0_2 = arith.constant 0 : index
    %1 = vector.load %arg2[%c0_1, %c0_2] : memref<128x256xbf16, #tpu.memory_space<vmem>>, vector<128x256xbf16>
    %cst = arith.constant dense<0.000000e+00> : vector<16x256xf32>
    %2 = tpu.matmul %0, %1, %cst {dimension_numbers = #tpu.dot_dimension_numbers<[1], [0], [0], [1], [0, 0, 1, 1], [], []>} : vector<16x128xbf16>, vector<128x256xbf16>, vector<16x256xf32> -> vector<16x256xf32>
    %c0_3 = arith.constant 0 : index
    %c0_4 = arith.constant 0 : index
    %3 = vector.load %arg3[%c0_3, %c0_4] : memref<1x256xf32, #tpu.memory_space<vmem>>, vector<1x256xf32>
    %4 = vector.broadcast %3 : vector<1x256xf32> to vector<16x256xf32>
    %5 = arith.addf %2, %4 : vector<16x256xf32>
    %cst_5 = arith.constant 0.000000e+00 : f32
    %6 = vector.broadcast %cst_5 : f32 to vector<16x256xf32>
    %7 = arith.maximumf %5, %6 : vector<16x256xf32>
    %8 = arith.truncf %7 : vector<16x256xf32> to vector<16x256xbf16>
    %c0_6 = arith.constant 0 : index
    %c0_7 = arith.constant 0 : index
    %9 = vector.load %arg4[%c0_6, %c0_7] : memref<256x512xbf16, #tpu.memory_space<vmem>>, vector<256x512xbf16>
    %cst_8 = arith.constant dense<0.000000e+00> : vector<16x512xf32>
    %10 = tpu.matmul %8, %9, %cst_8 {dimension_numbers = #tpu.dot_dimension_numbers<[1], [0], [0], [1], [0, 0, 1, 1], [], []>} : vector<16x256xbf16>, vector<256x512xbf16>, vector<16x512xf32> -> vector<16x512xf32>
    %c0_9 = arith.constant 0 : index
    %c0_10 = arith.constant 0 : index
    %11 = vector.load %arg5[%c0_9, %c0_10] : memref<1x512xf32, #tpu.memory_space<vmem>>, vector<1x512xf32>
    %12 = vector.broadcast %11 : vector<1x512xf32> to vector<16x512xf32>
    %13 = arith.addf %10, %12 : vector<16x512xf32>
    %cst_11 = arith.constant 0.000000e+00 : f32
    %14 = vector.broadcast %cst_11 : f32 to vector<16x512xf32>
    %15 = arith.maximumf %13, %14 : vector<16x512xf32>
    %16 = arith.truncf %15 : vector<16x512xf32> to vector<16x512xbf16>
    %c0_12 = arith.constant 0 : index
    %c0_13 = arith.constant 0 : index
    %17 = vector.load %arg6[%c0_12, %c0_13] : memref<512x128xbf16, #tpu.memory_space<vmem>>, vector<512x128xbf16>
    %cst_14 = arith.constant dense<0.000000e+00> : vector<16x128xf32>
    %18 = tpu.matmul %16, %17, %cst_14 {dimension_numbers = #tpu.dot_dimension_numbers<[1], [0], [0], [1], [0, 0, 1, 1], [], []>} : vector<16x512xbf16>, vector<512x128xbf16>, vector<16x128xf32> -> vector<16x128xf32>
    %c0_15 = arith.constant 0 : index
    %c0_16 = arith.constant 0 : index
    %19 = vector.load %arg7[%c0_15, %c0_16] : memref<1x128xf32, #tpu.memory_space<vmem>>, vector<1x128xf32>
    %20 = vector.broadcast %19 : vector<1x128xf32> to vector<16x128xf32>
    %21 = arith.addf %18, %20 : vector<16x128xf32>
    %c0_17 = arith.constant 0 : index
    %c0_18 = arith.constant 0 : index
    %22 = vector.load %arg8[%c0_17, %c0_18] : memref<16x128xf32, #tpu.memory_space<vmem>>, vector<16x128xf32>
    tpu.vector_store %arg8[%c0_17, %c0_18], %21 {strides = array<i32>} : memref<16x128xf32, #tpu.memory_space<vmem>>, vector<16x128xf32>,
    return
  }
  func.func @transform_0(%arg0: i32) -> (i32, i32) {
    %c0_i32 = arith.constant 0 : i32
    %c0_i32_0 = arith.constant 0 : i32
    return %arg0, %c0_i32 : i32, i32
  }
  func.func @transform_1(%arg0: i32) -> (i32, i32) {
    %c0_i32 = arith.constant 0 : i32
    %c0_i32_0 = arith.constant 0 : i32
    %c0_i32_1 = arith.constant 0 : i32
    return %c0_i32, %c0_i32_0 : i32, i32
  }
  func.func @transform_2(%arg0: i32) -> (i32, i32) {
    %c0_i32 = arith.constant 0 : i32
    %c0_i32_0 = arith.constant 0 : i32
    %c0_i32_1 = arith.constant 0 : i32
    return %c0_i32, %c0_i32_0 : i32, i32
  }
  func.func @transform_3(%arg0: i32) -> (i32, i32) {
    %c0_i32 = arith.constant 0 : i32
    %c0_i32_0 = arith.constant 0 : i32
    %c0_i32_1 = arith.constant 0 : i32
    return %c0_i32, %c0_i32_0 : i32, i32
  }
  func.func @transform_4(%arg0: i32) -> (i32, i32) {
    %c0_i32 = arith.constant 0 : i32
    %c0_i32_0 = arith.constant 0 : i32
    %c0_i32_1 = arith.constant 0 : i32
    return %c0_i32, %c0_i32_0 : i32, i32
  }
  func.func @transform_5(%arg0: i32) -> (i32, i32) {
    %c0_i32 = arith.constant 0 : i32
    %c0_i32_0 = arith.constant 0 : i32
    %c0_i32_1 = arith.constant 0 : i32
    return %c0_i32, %c0_i32_0 : i32, i32
  }
  func.func @transform_6(%arg0: i32) -> (i32, i32) {
    %c0_i32 = arith.constant 0 : i32
    %c0_i32_0 = arith.constant 0 : i32
    %c0_i32_1 = arith.constant 0 : i32
    return %c0_i32, %c0_i32_0 : i32, i32
  }
  func.func @transform_7(%arg0: i32) -> (i32, i32) {
    %c0_i32 = arith.constant 0 : i32
    %c0_i32_0 = arith.constant 0 : i32
    return %arg0, %c0_i32 : i32, i32
  }
}

</mosaic_0001>

<bundles_post_ra>
// kernel: generator_forward.1
= control target key start
LH: loop header
LB: loop body
LE: loop exit
PB: predicated region body
PF: predicated region fallthrough
CT: control target
= control target key end

     0   :  { %12 = vsyncpa [#allocation3], 0  ;;  %s1566_s0 = inlined_call_operand.vmem [shape: bf16[16,128], index: 0, kind: input, shape index: {}]   ;;  %s1567_s1 = inlined_call_operand.hbm [shape: bf16[128,256], index: 1, kind: input, shape index: {}]   ;;  %s1568_s2 = inlined_call_operand.vmem [shape: f32[1,256], index: 2, kind: input, shape index: {}]   ;;  %s1569_s3 = inlined_call_operand.hbm [shape: bf16[256,512], index: 3, kind: input, shape index: {}]   ;;  %s1570_s4 = inlined_call_operand.vmem [shape: f32[1,512], index: 4, kind: input, shape index: {}]   ;;  %s1571_s5 = inlined_call_operand.hbm [shape: bf16[512,128], index: 5, kind: input, shape index: {}]   ;;  %s1572_s6 = inlined_call_operand.vmem [shape: f32[1,128], index: 6, kind: input, shape index: {}]   ;;  %s1573_s7 = inlined_call_operand.vmem [shape: f32[16,128], index: 7, kind: output, shape index: {}]  }
   0x1   :  { %13 = vsyncpa [#allocation5], 0  ;;  %s1475_s24 = smov [#allocation4]  }
   0x2   :  { %s35_s25 = sshll.u32 %s1475_s24, 4  ;;  %s36_s25 = int_to_ptr.vmem [resolvable:$true] %s35_s25 }
   0x3   :  { %s1419_s26 = scalar_lea.vmem %s36_s25, 8192  ;;  %p1424_p1 = scmp.lt.s32.totalorder %s36_s25, %s36_s25 }
   0x4   :  { %p1420_p0 = scmp.ne.s32.totalorder %s36_s25, %s1419_s26  ;;  %p1425_p2 = scmp.lt.s32.totalorder %s1419_s26, %s1419_s26 }
   0x6   :  { %p1426_p3 = por %p1425_p2, %p1424_p1 }
   0x8   :  { %p1427_p4 = pnand %p1426_p3, %p1420_p0 }
   0xa   :  { %1430 = shalt.err (!%p1427_p4)
}
   0xb   :  { %s1476_s27 = smov 256   ;;  %s1477_s28 = smov 16  }
   0xc   :  { %41 = dma.hbm_to_vmem [thread:$0]  %s1569_s3, 8192, %s36_s25, [#allocation5], %s1476_s27, %s1476_s27, %s1477_s28  }
   0xd   :  { %s1478_s8 = smov [#allocation2]  }
   0xe   :  { %s21_s9 = sshll.u32 %s1478_s8, 4  ;;  %s22_s9 = int_to_ptr.vmem [resolvable:$true] %s21_s9 }
   0xf   :  { %s1439_s10 = scalar_lea.vmem %s22_s9, 2048  ;;  %p1444_p6 = scmp.lt.s32.totalorder %s22_s9, %s22_s9 }
  0x10   :  { %p1440_p5 = scmp.ne.s32.totalorder %s22_s9, %s1439_s10  ;;  %p1445_p7 = scmp.lt.s32.totalorder %s1439_s10, %s1439_s10 }
  0x12   :  { %p1446_p8 = por %p1445_p7, %p1444_p6 }
  0x14   :  { %p1447_p9 = pnand %p1446_p8, %p1440_p5 }
  0x16   :  { %1450 = shalt.err (!%p1447_p9)
}
  0x17   :  { %s1479_s11 = smov 128   ;;  %s1480_s12 = smov 8  }
  0x18   :  { %27 = dma.hbm_to_vmem [thread:$0]  %s1567_s1, 2048, %s22_s9, [#allocation3], %s1479_s11, %s1479_s11, %s1480_s12  }
  0x19   :  { %s1481_s15 = smov [#allocation6]  }
  0x1a   :  { %s49_s16 = sshll.u32 %s1481_s15, 4  ;;  %s50_s16 = int_to_ptr.vmem [resolvable:$true] %s49_s16 }
  0x1b   :  { %s1459_s3 = scalar_lea.vmem %s50_s16, 4096  ;;  %p1464_p11 = scmp.lt.s32.totalorder %s50_s16, %s50_s16 }
  0x1c   :  { %p1460_p10 = scmp.ne.s32.totalorder %s50_s16, %s1459_s3  ;;  %p1465_p12 = scmp.lt.s32.totalorder %s1459_s3, %s1459_s3 }
  0x1e   :  { %p1466_p13 = por %p1465_p12, %p1464_p11 }
  0x20   :  { %p1467_p0 = pnand %p1466_p13, %p1460_p10 }
  0x22   :  { %1470 = shalt.err (!%p1467_p0)
}
  0x23   :  { %s1482_s17 = smov 64   ;;  %s1483_s18 = smov 4  }
  0x24   :  { %55 = dma.hbm_to_vmem [thread:$0]  %s1571_s5, 4096, %s50_s16, [#allocation5], %s1482_s17, %s1482_s17, %s1483_s18  }
  0x25   :  { %1471 = dma.done.wait [#allocation3], 2048  }
  0x26   :  { %1472 = vsyncadd [#allocation3], 4294965248 }
  0x27   :  { %1473 = dma.done.wait [#allocation5], 12288  }
  0x28   :  { %1474 = vsyncadd [#allocation5], 4294955008  ;;  %v1484_v0 = vmov 0   ;;  %v1258_v1 = vld [vmem:[#allocation2 + $0x74] ss:$8 sps:$4 sm:$0xff]   ;;  %v1282_v29 = vld [vmem:[%s1566_s0] sm:$0xff]  }
  0x29   :  { %216 = vmatprep.mubr.bf16.mxu0 %v1484_v0  ;;  %v1260_v2 = vld [vmem:[#allocation2 + $0x70] ss:$8 sps:$4 sm:$0xff]   ;;  %184 = vmatprep.subr.bf16.mxu0 %v1258_v1  ;;  %v1261_v3 = vld [vmem:[#allocation2 + $0x64] ss:$8 sps:$4 sm:$0xff]   ;;  %v1263_v4 = vld [vmem:[#allocation2 + $0x60] ss:$8 sps:$4 sm:$0xff]  }
  0x2a   :  { %185 = vmatpush1.bf16.msra.mxu0 %v1260_v2  ;;  %v1264_v5 = vld [vmem:[#allocation2 + $0x54] ss:$8 sps:$4 sm:$0xff]   ;;  %v1266_v6 = vld [vmem:[#allocation2 + $0x50] ss:$8 sps:$4 sm:$0xff]   ;;  %v1267_v7 = vld [vmem:[#allocation2 + $0x44] ss:$8 sps:$4 sm:$0xff]  }
  0x2b   :  { %186 = vmatprep.subr.bf16.mxu0 %v1261_v3  ;;  %v1269_v8 = vld [vmem:[#allocation2 + $0x40] ss:$8 sps:$4 sm:$0xff]   ;;  %v1270_v9 = vld [vmem:[#allocation2 + $0x34] ss:$8 sps:$4 sm:$0xff]   ;;  %v1272_v11 = vld [vmem:[#allocation2 + $0x30] ss:$8 sps:$4 sm:$0xff]  }
  0x2c   :  { %v1283_v10 = vld [vmem:[#allocation4 + $0xe4] ss:$16 sps:$4 sm:$0xff]   ;;  %v1288_v12 = vld [vmem:[#allocation4 + $0xe0] ss:$16 sps:$4 sm:$0xff]   ;;  %v1287_v26 = vld [vmem:[#allocation4 + $0xec] ss:$16 sps:$4 sm:$0xff]  }
  0x2d   :  { %639 = vmatprep.subr.bf16.mxu1 %v1283_v10  ;;  %v1289_v13 = vld [vmem:[#allocation4 + $0xc4] ss:$16 sps:$4 sm:$0xff]   ;;  %v1294_v15 = vld [vmem:[#allocation4 + $0xc0] ss:$16 sps:$4 sm:$0xff]   ;;  %v1285_v30 = vld [vmem:[#allocation4 + $0xe8] ss:$16 sps:$4 sm:$0xff]  }
  0x2e   :  { %187 = vmatpush1.bf16.msra.mxu0 %v1263_v4  ;;  %v1273_v14 = vld [vmem:[#allocation2 + $0x24] ss:$8 sps:$4 sm:$0xff]   ;;  %640 = vmatpush1.bf16.msra.mxu1 %v1288_v12  ;;  %v1275_v17 = vld [vmem:[#allocation2 + $0x20] ss:$8 sps:$4 sm:$0xff]   ;;  %v1276_v18 = vld [vmem:[#allocation2 + $0x14] ss:$8 sps:$4 sm:$0xff]  }
  0x2f   :  { %188 = vmatprep.subr.bf16.mxu0 %v1264_v5  ;;  %641 = vmatprep.subr.bf16.mxu1 %v1289_v13  ;;  %v1295_v16 = vld [vmem:[#allocation4 + $0xa4] ss:$16 sps:$4 sm:$0xff]   ;;  %v1300_v19 = vld [vmem:[#allocation4 + $0xa0] ss:$16 sps:$4 sm:$0xff]   ;;  %v1293_v31 = vld [vmem:[#allocation4 + $0xcc] ss:$16 sps:$4 sm:$0xff]  }
  0x30   :  { %v1301_v20 = vld [vmem:[#allocation4 + $0x84] ss:$16 sps:$4 sm:$0xff]   ;;  %v1278_v21 = vld [vmem:[#allocation2 + $0x10] ss:$8 sps:$4 sm:$0xff]   ;;  %v1281_v25 = vld [vmem:[#allocation2] ss:$8 sps:$4 sm:$0xff]  }
  0x31   :  { %v1279_v22 = vld [vmem:[#allocation2 + $0x4] ss:$8 sps:$4 sm:$0xff]   ;;  %v1306_v23 = vld [vmem:[#allocation4 + $0x80] ss:$16 sps:$4 sm:$0xff]   ;;  %v1291_v34 = vld [vmem:[#allocation4 + $0xc8] ss:$16 sps:$4 sm:$0xff]  }
  0x32   :  { %189 = vmatpush1.bf16.msra.mxu0 %v1266_v6  ;;  %642 = vmatpush1.bf16.msra.mxu1 %v1294_v15  ;;  %v1307_v24 = vld [vmem:[#allocation4 + $0x64] ss:$16 sps:$4 sm:$0xff]   ;;  %v1312_v27 = vld [vmem:[#allocation4 + $0x60] ss:$16 sps:$4 sm:$0xff]   ;;  %v1299_v35 = vld [vmem:[#allocation4 + $0xac] ss:$16 sps:$4 sm:$0xff]  }
  0x33   :  { %190 = vmatprep.subr.bf16.mxu0 %v1267_v7  ;;  %643 = vmatprep.subr.bf16.mxu1 %v1295_v16  ;;  %v1313_v28 = vld [vmem:[#allocation4 + $0x44] ss:$16 sps:$4 sm:$0xff]   ;;  %v1318_v32 = vld [vmem:[#allocation4 + $0x40] ss:$16 sps:$4 sm:$0xff]   ;;  %v1297_v38 = vld [vmem:[#allocation4 + $0xa8] ss:$16 sps:$4 sm:$0xff]  }
  0x34   :  { %v1319_v33 = vld [vmem:[#allocation4 + $0x24] ss:$16 sps:$4 sm:$0xff]   ;;  %v1324_v36 = vld [vmem:[#allocation4 + $0x20] ss:$16 sps:$4 sm:$0xff]   ;;  %v1305_v39 = vld [vmem:[#allocation4 + $0x8c] ss:$16 sps:$4 sm:$0xff]  }
  0x35   :  { %v1325_v37 = vld [vmem:[#allocation4 + $0x4] ss:$16 sps:$4 sm:$0xff]   ;;  %v1330_v40 = vld [vmem:[#allocation4] ss:$16 sps:$4 sm:$0xff]   ;;  %v1303_v42 = vld [vmem:[#allocation4 + $0x88] ss:$16 sps:$4 sm:$0xff]  }
  0x36   :  { %191 = vmatpush1.bf16.msra.mxu0 %v1269_v8  ;;  %644 = vmatpush1.bf16.msra.mxu1 %v1300_v19  ;;  %v1331_v41 = vld [vmem:[#allocation4 + $0x1e4] ss:$16 sps:$4 sm:$0xff]   ;;  %v1311_v43 = vld [vmem:[#allocation4 + $0x6c] ss:$16 sps:$4 sm:$0xff]   ;;  %v1336_v44 = vld [vmem:[#allocation4 + $0x1e0] ss:$16 sps:$4 sm:$0xff]  }
  0x37   :  { %192 = vmatprep.subr.bf16.mxu0 %v1270_v9  ;;  %645 = vmatprep.subr.bf16.mxu1 %v1301_v20  ;;  %v1309_v45 = vld [vmem:[#allocation4 + $0x68] ss:$16 sps:$4 sm:$0xff]   ;;  %v1337_v46 = vld [vmem:[#allocation4 + $0x1c4] ss:$16 sps:$4 sm:$0xff]   ;;  %v1317_v47 = vld [vmem:[#allocation4 + $0x4c] ss:$16 sps:$4 sm:$0xff]   ;;  %v88_v20 = vlaneseq }
  0x38   :  { %v1342_v48 = vld [vmem:[#allocation4 + $0x1c0] ss:$16 sps:$4 sm:$0xff]   ;;  %v1343_v49 = vld [vmem:[#allocation4 + $0x1a4] ss:$16 sps:$4 sm:$0xff]   ;;  %v1315_v50 = vld [vmem:[#allocation4 + $0x48] ss:$16 sps:$4 sm:$0xff]  }
  0x39   :  { %v1323_v51 = vld [vmem:[#allocation4 + $0x2c] ss:$16 sps:$4 sm:$0xff]   ;;  %v1348_v52 = vld [vmem:[#allocation4 + $0x1a0] ss:$16 sps:$4 sm:$0xff]   ;;  %v1349_v53 = vld [vmem:[#allocation4 + $0x184] ss:$16 sps:$4 sm:$0xff]  }
  0x3a   :  { %193 = vmatpush1.bf16.msra.mxu0 %v1272_v11  ;;  %646 = vmatpush1.bf16.msra.mxu1 %v1306_v23  ;;  %v1321_v54 = vld [vmem:[#allocation4 + $0x28] ss:$16 sps:$4 sm:$0xff]   ;;  %v1329_v55 = vld [vmem:[#allocation4 + $0xc] ss:$16 sps:$4 sm:$0xff]   ;;  %v1354_v56 = vld [vmem:[#allocation4 + $0x180] ss:$16 sps:$4 sm:$0xff]  }
  0x3b   :  { %194 = vmatprep.subr.bf16.mxu0 %v1273_v14  ;;  %647 = vmatprep.subr.bf16.mxu1 %v1307_v24  ;;  %v1355_v57 = vld [vmem:[#allocation4 + $0x164] ss:$16 sps:$4 sm:$0xff]   ;;  %v1327_v58 = vld [vmem:[#allocation4 + $0x8] ss:$16 sps:$4 sm:$0xff]   ;;  %v1335_v59 = vld [vmem:[#allocation4 + $0x1ec] ss:$16 sps:$4 sm:$0xff]  }
  0x3c   :  { %v1360_v60 = vld [vmem:[#allocation4 + $0x160] ss:$16 sps:$4 sm:$0xff]   ;;  %v1333_v61 = vld [vmem:[#allocation4 + $0x1e8] ss:$16 sps:$4 sm:$0xff]   ;;  %v1341_v62 = vld [vmem:[#allocation4 + $0x1cc] ss:$16 sps:$4 sm:$0xff]  }
  0x3d   :  { %v1339_v63 = vld [vmem:[#allocation4 + $0x1c8] ss:$16 sps:$4 sm:$0xff]   ;;  %v1347_v0 = vld [vmem:[#allocation4 + $0x1ac] ss:$16 sps:$4 sm:$0xff]   ;;  %v1361_v6 = vld [vmem:[#allocation4 + $0x144] ss:$16 sps:$4 sm:$0xff]  }
  0x3e   :  { %195 = vmatpush1.bf16.msra.mxu0 %v1275_v17  ;;  %648 = vmatpush1.bf16.msra.mxu1 %v1312_v27  ;;  %v1345_v1 = vld [vmem:[#allocation4 + $0x1a8] ss:$16 sps:$4 sm:$0xff]   ;;  %v1353_v2 = vld [vmem:[#allocation4 + $0x18c] ss:$16 sps:$4 sm:$0xff]   ;;  %v1366_v9 = vld [vmem:[#allocation4 + $0x140] ss:$16 sps:$4 sm:$0xff]  }
  0x3f   :  { %196 = vmatprep.subr.bf16.mxu0 %v1276_v18  ;;  %649 = vmatprep.subr.bf16.mxu1 %v1313_v28  ;;  %v1351_v3 = vld [vmem:[#allocation4 + $0x188] ss:$16 sps:$4 sm:$0xff]   ;;  %v1359_v4 = vld [vmem:[#allocation4 + $0x16c] ss:$16 sps:$4 sm:$0xff]   ;;  %v1367_v10 = vld [vmem:[#allocation4 + $0x124] ss:$16 sps:$4 sm:$0xff]  }
  0x40   :  { %v1357_v5 = vld [vmem:[#allocation4 + $0x168] ss:$16 sps:$4 sm:$0xff]   ;;  %v1365_v7 = vld [vmem:[#allocation4 + $0x14c] ss:$16 sps:$4 sm:$0xff]   ;;  %v1372_v13 = vld [vmem:[#allocation4 + $0x120] ss:$16 sps:$4 sm:$0xff]  }
  0x41   :  { %v1363_v8 = vld [vmem:[#allocation4 + $0x148] ss:$16 sps:$4 sm:$0xff]   ;;  %v1371_v11 = vld [vmem:[#allocation4 + $0x12c] ss:$16 sps:$4 sm:$0xff]   ;;  %v1373_v14 = vld [vmem:[#allocation4 + $0x104] ss:$16 sps:$4 sm:$0xff]  }
  0x42   :  { %197 = vmatpush1.bf16.msra.mxu0 %v1278_v21  ;;  %650 = vmatpush1.bf16.msra.mxu1 %v1318_v32  ;;  %v1369_v12 = vld [vmem:[#allocation4 + $0x128] ss:$16 sps:$4 sm:$0xff]   ;;  %v1377_v15 = vld [vmem:[#allocation4 + $0x10c] ss:$16 sps:$4 sm:$0xff]   ;;  %v1378_v17 = vld [vmem:[#allocation4 + $0x100] ss:$16 sps:$4 sm:$0xff]  }
  0x43   :  { %198 = vmatprep.subr.bf16.mxu0 %v1279_v22  ;;  %651 = vmatprep.subr.bf16.mxu1 %v1319_v33  ;;  %v1375_v16 = vld [vmem:[#allocation4 + $0x108] ss:$16 sps:$4 sm:$0xff]   ;;  %v1537_v21 = vshrl.u32 %v88_v20, 7  ;;  %v86_v24 = vld [vmem:[%s1568_s2] sm:$0x3] }
  0x44   :  { %v1379_v18 = vld [vmem:[#allocation6 + $0x78] sm:$0xff]  }
  0x45   :  { %v1380_v19 = vld [vmem:[#allocation6 + $0xf8] sm:$0xff]   ;;  %v94_v22 = vsub.s32 1, %v1537_v21  ;;  %v90_v23 = vsub.s32 0, %v1537_v21 }
  0x46   :  { %199 = vmatpush1.bf16.msra.mxu0 %v1281_v25  ;;  %652 = vmatpush1.bf16.msra.mxu1 %v1324_v36 }
  0x47   :  { %682 = vmatprep.subr.bf16.mxu0 %v1287_v26  ;;  %653 = vmatprep.subr.bf16.mxu1 %v1325_v37  ;;  %v95_v26 = vrot.slane %v86_v24, %v94_v22  ;;  %v91_v27 = vrot.slane %v86_v24, %v90_v23 }
  0x49   :  { %217 = vmatmul.mubr.bf16.vlgmr.msra.gmra.mxu0 %v1282_v29 }
  0x4a   :  { %683 = vmatpush1.bf16.msra.mxu0 %v1285_v30  ;;  %654 = vmatpush1.bf16.msra.mxu1 %v1330_v40  ;;  %v1381_v40 = vld [vmem:[#allocation6 + $0x38] sm:$0xff]  }
  0x4b   :  { %684 = vmatprep.subr.bf16.mxu0 %v1293_v31  ;;  %655 = vmatprep.subr.bf16.mxu1 %v1331_v41  ;;  %v1382_v41 = vld [vmem:[#allocation6 + $0xb8] sm:$0xff]  }
  0x4e   :  { %685 = vmatpush1.bf16.msra.mxu0 %v1291_v34  ;;  %656 = vmatpush2.bf16.msra.mxu1 %v1336_v44  ;;  %v1384_v44 = vld [vmem:[#allocation6 + $0xf0] sm:$0xff]  }
  0x4f   :  { %686 = vmatprep.subr.bf16.mxu0 %v1299_v35  ;;  %657 = vmatprep.subr.bf16.mxu1 %v1337_v46  ;;  %v1386_v46 = vld [vmem:[#allocation6 + $0xb0] sm:$0xff]  }
  0x52   :  { %687 = vmatpush1.bf16.msra.mxu0 %v1297_v38  ;;  %658 = vmatpush2.bf16.msra.mxu1 %v1342_v48  ;;  %v1388_v48 = vld [vmem:[#allocation6 + $0xe8] sm:$0xff]  }
  0x53   :  { %688 = vmatprep.subr.bf16.mxu0 %v1305_v39  ;;  %659 = vmatprep.subr.bf16.mxu1 %v1343_v49  ;;  %v1389_v49 = vld [vmem:[#allocation6 + $0x28] sm:$0xff]  }
  0x56   :  { %689 = vmatpush1.bf16.msra.mxu0 %v1303_v42  ;;  %660 = vmatpush2.bf16.msra.mxu1 %v1348_v52  ;;  %v1392_v52 = vld [vmem:[#allocation6 + $0xe0] sm:$0xff]  }
  0x57   :  { %690 = vmatprep.subr.bf16.mxu0 %v1311_v43  ;;  %661 = vmatprep.subr.bf16.mxu1 %v1349_v53  ;;  %v1383_v43 = vld [vmem:[#allocation6 + $0x70] sm:$0xff]   ;;  %v1393_v53 = vld [vmem:[#allocation6 + $0x20] sm:$0xff]  }
  0x5a   :  { %691 = vmatpush1.bf16.msra.mxu0 %v1309_v45  ;;  %662 = vmatpush2.bf16.msra.mxu1 %v1354_v56  ;;  %v1385_v45 = vld [vmem:[#allocation6 + $0x30] sm:$0xff]   ;;  %v1396_v56 = vld [vmem:[#allocation6 + $0xd8] sm:$0xff]  }
  0x5b   :  { %692 = vmatprep.subr.bf16.mxu0 %v1317_v47  ;;  %663 = vmatprep.subr.bf16.mxu1 %v1355_v57  ;;  %v1387_v47 = vld [vmem:[#allocation6 + $0x68] sm:$0xff]   ;;  %v1397_v57 = vld [vmem:[#allocation6 + $0x18] sm:$0xff]  }
  0x5e   :  { %693 = vmatpush1.bf16.msra.mxu0 %v1315_v50  ;;  %664 = vmatpush2.bf16.msra.mxu1 %v1360_v60  ;;  %v1390_v50 = vld [vmem:[#allocation6 + $0xa8] sm:$0xff]   ;;  %v1400_v60 = vld [vmem:[#allocation6 + $0xd0] sm:$0xff]  }
  0x5f   :  { %694 = vmatprep.subr.bf16.mxu0 %v1323_v51  ;;  %665 = vmatprep.subr.bf16.mxu1 %v1361_v6  ;;  %v1391_v51 = vld [vmem:[#allocation6 + $0x60] sm:$0xff]  }
  0x60   :  { %v1410_v6 = vld [vmem:[#allocation6 + $0x80] sm:$0xff]  }
  0x62   :  { %695 = vmatpush1.bf16.msra.mxu0 %v1321_v54  ;;  %666 = vmatpush2.bf16.msra.mxu1 %v1366_v9  ;;  %v1394_v54 = vld [vmem:[#allocation6 + $0xa0] sm:$0xff]  }
  0x63   :  { %696 = vmatprep.subr.bf16.mxu0 %v1329_v55  ;;  %667 = vmatprep.subr.bf16.mxu1 %v1367_v10  ;;  %v1395_v55 = vld [vmem:[#allocation6 + $0x58] sm:$0xff]   ;;  %v297_v9 = vld [vmem:[%s1570_s4] sm:$0xf] }
  0x66   :  { %697 = vmatpush1.bf16.msra.mxu0 %v1327_v58  ;;  %668 = vmatpush2.bf16.msra.mxu1 %v1372_v13  ;;  %v1398_v58 = vld [vmem:[#allocation6 + $0x98] sm:$0xff]  }
  0x67   :  { %698 = vmatprep.subr.bf16.mxu0 %v1335_v59  ;;  %669 = vmatprep.subr.bf16.mxu1 %v1373_v14  ;;  %v1399_v59 = vld [vmem:[#allocation6 + $0x50] sm:$0xff]   ;;  %v302_v14 = vrot.slane %v297_v9, %v90_v23 }
  0x6a   :  { %699 = vmatpush2.bf16.msra.mxu0 %v1333_v61  ;;  %670 = vmatpush2.bf16.msra.mxu1 %v1378_v17  ;;  %v1401_v61 = vld [vmem:[#allocation6 + $0x10] sm:$0xff]  }
  0x6b   :  { %700 = vmatprep.subr.bf16.mxu0 %v1341_v62  ;;  %1204 = vmatprep.subr.bf16.mxu1 %v1379_v18  ;;  %v1402_v62 = vld [vmem:[#allocation6 + $0x90] sm:$0xff]  }
  0x6e   :  { %701 = vmatpush2.bf16.msra.mxu0 %v1339_v63  ;;  %v1403_v63 = vld [vmem:[#allocation6 + $0x48] sm:$0xff]  }
  0x6f   :  { %702 = vmatprep.subr.bf16.mxu0 %v1347_v0  ;;  %v1404_v0 = vld [vmem:[#allocation6 + $0xc8] sm:$0xff]  }
  0x72   :  { %703 = vmatpush2.bf16.msra.mxu0 %v1345_v1  ;;  %v1405_v1 = vld [vmem:[#allocation6 + $0x8] sm:$0xff]  }
  0x73   :  { %704 = vmatprep.subr.bf16.mxu0 %v1353_v2  ;;  %v1406_v2 = vld [vmem:[#allocation6 + $0x88] sm:$0xff]  }
  0x76   :  { %705 = vmatpush2.bf16.msra.mxu0 %v1351_v3  ;;  %v1407_v3 = vld [vmem:[#allocation6 + $0x40] sm:$0xff]  }
  0x77   :  { %706 = vmatprep.subr.bf16.mxu0 %v1359_v4  ;;  %v1408_v4 = vld [vmem:[#allocation6 + $0xc0] sm:$0xff]  }
  0x7a   :  { %707 = vmatpush2.bf16.msra.mxu0 %v1357_v5  ;;  %v1409_v5 = vld [vmem:[#allocation6] sm:$0xff]  }
  0x7b   :  { %708 = vmatprep.subr.bf16.mxu0 %v1365_v7  ;;  %v313_v7 = vsub.s32 3, %v1537_v21 }
  0x7d   :  { %v314_v13 = vrot.slane %v297_v9, %v313_v7 }
  0x7e   :  { %709 = vmatpush2.bf16.msra.mxu0 %v1363_v8  ;;  %v309_v8 = vsub.s32 2, %v1537_v21 }
  0x7f   :  { %710 = vmatprep.subr.bf16.mxu0 %v1371_v11 }
  0x82   :  { %711 = vmatpush2.bf16.msra.mxu0 %v1369_v12  ;;  %v306_v12 = vrot.slane %v297_v9, %v94_v22 }
  0x83   :  { %712 = vmatprep.subr.bf16.mxu0 %v1377_v15  ;;  %v310_v15 = vrot.slane %v297_v9, %v309_v8 }
  0x86   :  { %713 = vmatpush2.bf16.msra.mxu0 %v1375_v16 }
  0x87   :  { %1226 = vmatprep.subr.bf16.mxu0 %v1380_v19 }
 0x109   :  { %v218_v25 = vpop.f32.mrf.mxu0 }
 0x10a   :  { %v219_v32 = vadd.f32 %v218_v25, %v91_v27 }
 0x10b   :  { %v220_v28 = vpop.f32.mrf.mxu0 }
 0x10c   :  { %v221_v30 = vadd.f32 %v220_v28, %v95_v26  ;;  %v227_v38 = vmax.f32 %v219_v32, 0.0 }
 0x10d   :  { %v222_v29 = vpop.f32.mrf.mxu0 }
 0x10e   :  { %v223_v31 = vadd.f32 %v222_v29, %v91_v27  ;;  %v228_v36 = vmax.f32 %v221_v30, 0.0 }
 0x10f   :  { %v224_v33 = vpop.f32.mrf.mxu0 }
 0x110   :  { %v225_v34 = vadd.f32 %v224_v33, %v95_v26  ;;  %v229_v35 = vmax.f32 %v223_v31, 0.0 }
 0x112   :  { %v230_v37 = vmax.f32 %v225_v34, 0.0  ;;  %v231_v42 = vpack.c.bf16 %v229_v35, %v227_v38 }
 0x114   :  { %v232_v39 = vpack.c.bf16 %v230_v37, %v228_v36 }
 0x116   :  { %671 = vmatprep.mubr.bf16.mxu1 %v232_v39  ;;  %714 = vmatprep.mubr.bf16.mxu0 %v232_v39 }
 0x117   :  { %672 = vmatmul.mubr.bf16.vlgmr.msra.gmra.mxu1 %v231_v42  ;;  %715 = vmatmul.mubr.bf16.vlgmr.msra.gmra.mxu0 %v231_v42 }
 0x118   :  { %1205 = vmatpush3.bf16.msra.mxu1 %v1381_v40  ;;  %1227 = vmatpush3.bf16.msra.mxu0 %v1382_v41 }
 0x119   :  { %1206 = vmatprep.subr.bf16.mxu1 %v1383_v43  ;;  %1228 = vmatprep.subr.bf16.mxu0 %v1384_v44  ;;  %v1171_v44 = vld [vmem:[%s1572_s6] ss:$0 sm:$0xff] }
 0x11c   :  { %1207 = vmatpush3.bf16.msra.mxu1 %v1385_v45  ;;  %1229 = vmatpush3.bf16.msra.mxu0 %v1386_v46 }
 0x11d   :  { %1208 = vmatprep.subr.bf16.mxu1 %v1387_v47  ;;  %1230 = vmatprep.subr.bf16.mxu0 %v1388_v48 }
 0x120   :  { %1209 = vmatpush3.bf16.msra.mxu1 %v1389_v49  ;;  %1231 = vmatpush3.bf16.msra.mxu0 %v1390_v50 }
 0x121   :  { %1210 = vmatprep.subr.bf16.mxu1 %v1391_v51  ;;  %1232 = vmatprep.subr.bf16.mxu0 %v1392_v52 }
 0x124   :  { %1211 = vmatpush3.bf16.msra.mxu1 %v1393_v53  ;;  %1233 = vmatpush3.bf16.msra.mxu0 %v1394_v54 }
 0x125   :  { %1212 = vmatprep.subr.bf16.mxu1 %v1395_v55  ;;  %1234 = vmatprep.subr.bf16.mxu0 %v1396_v56 }
 0x128   :  { %1213 = vmatpush3.bf16.msra.mxu1 %v1397_v57  ;;  %1235 = vmatpush3.bf16.msra.mxu0 %v1398_v58 }
 0x129   :  { %1214 = vmatprep.subr.bf16.mxu1 %v1399_v59  ;;  %1236 = vmatprep.subr.bf16.mxu0 %v1400_v60 }
 0x12c   :  { %1215 = vmatpush3.bf16.msra.mxu1 %v1401_v61  ;;  %1237 = vmatpush3.bf16.msra.mxu0 %v1402_v62 }
 0x12d   :  { %1216 = vmatprep.subr.bf16.mxu1 %v1403_v63  ;;  %1238 = vmatprep.subr.bf16.mxu0 %v1404_v0 }
 0x130   :  { %1217 = vmatpush3.bf16.msra.mxu1 %v1405_v1  ;;  %1239 = vmatpush3.bf16.msra.mxu0 %v1406_v2 }
 0x131   :  { %1218 = vmatprep.subr.bf16.mxu1 %v1407_v3  ;;  %1240 = vmatprep.subr.bf16.mxu0 %v1408_v4 }
 0x134   :  { %1219 = vmatpush3.bf16.msra.mxu1 %v1409_v5  ;;  %1241 = vmatpush3.bf16.msra.mxu0 %v1410_v6 }
 0x1d7   :  { %v673_v10 = vpop.f32.mrf.mxu1  ;;  %v716_v11 = vpop.f32.mrf.mxu0 }
 0x1d8   :  { %v674_v27 = vadd.f32 %v673_v10, %v302_v14  ;;  %v717_v28 = vadd.f32 %v716_v11, %v310_v15 }
 0x1d9   :  { %v675_v16 = vpop.f32.mrf.mxu1  ;;  %v718_v17 = vpop.f32.mrf.mxu0 }
 0x1da   :  { %v676_v20 = vadd.f32 %v675_v16, %v306_v12  ;;  %v719_v24 = vadd.f32 %v718_v17, %v314_v13  ;;  %v725_v36 = vmax.f32 %v674_v27, 0.0  ;;  %v727_v37 = vmax.f32 %v717_v28, 0.0 }
 0x1db   :  { %v677_v18 = vpop.f32.mrf.mxu1  ;;  %v720_v19 = vpop.f32.mrf.mxu0 }
 0x1dc   :  { %v678_v25 = vadd.f32 %v677_v18, %v302_v14  ;;  %v721_v26 = vadd.f32 %v720_v19, %v310_v15  ;;  %v726_v34 = vmax.f32 %v676_v20, 0.0  ;;  %v728_v21 = vmax.f32 %v719_v24, 0.0 }
 0x1dd   :  { %v679_v29 = vpop.f32.mrf.mxu1  ;;  %v722_v30 = vpop.f32.mrf.mxu0 }
 0x1de   :  { %v680_v31 = vadd.f32 %v679_v29, %v306_v12  ;;  %v723_v32 = vadd.f32 %v722_v30, %v314_v13  ;;  %v729_v22 = vmax.f32 %v678_v25, 0.0  ;;  %v731_v33 = vmax.f32 %v721_v26, 0.0 }
 0x1e0   :  { %v730_v23 = vmax.f32 %v680_v31, 0.0  ;;  %v732_v35 = vmax.f32 %v723_v32, 0.0  ;;  %v733_v40 = vpack.c.bf16 %v729_v22, %v725_v36  ;;  %v735_v41 = vpack.c.bf16 %v731_v33, %v727_v37 }
 0x1e2   :  { %v734_v38 = vpack.c.bf16 %v730_v23, %v726_v34  ;;  %v736_v39 = vpack.c.bf16 %v732_v35, %v728_v21 }
 0x1e4   :  { %1032 = vmatprep.mubr.bf16.mxu1 %v734_v38  ;;  %1073 = vmatprep.mubr.bf16.mxu0 %v736_v39 }
 0x1e5   :  { %1033 = vmatmul.mubr.bf16.vlgmr.msra.gmra.mxu1 %v733_v40  ;;  %1074 = vmatmul.mubr.bf16.vlgmr.msra.gmra.mxu0 %v735_v41 }
 0x2a5   :  { %v1220_v42 = vpop.f32.mrf.mxu1  ;;  %v1242_v43 = vpop.f32.mrf.mxu0 }
 0x2a7   :  { %v1221_v45 = vpop.f32.mrf.mxu1  ;;  %v1243_v46 = vpop.f32.mrf.mxu0 }
 0x2a8   :  { %v1222_v47 = vadd.f32 %v1221_v45, %v1220_v42  ;;  %v1244_v51 = vadd.f32 %v1243_v46, %v1242_v43 }
 0x2a9   :  { %v1223_v48 = vpop.f32.mrf.mxu1  ;;  %v1245_v49 = vpop.f32.mrf.mxu0 }
 0x2aa   :  { %v1035_v50 = vadd.f32 %v1222_v47, %v1171_v44 }
 0x2ab   :  { %v1224_v52 = vpop.f32.mrf.mxu1  ;;  %v1246_v53 = vpop.f32.mrf.mxu0 }
 0x2ac   :  { %v1076_v54 = vadd.f32 %v1244_v51, %v1035_v50  ;;  %v1225_v55 = vadd.f32 %v1224_v52, %v1223_v48  ;;  %v1247_v57 = vadd.f32 %v1246_v53, %v1245_v49 }
 0x2ae   :  { %1082 = vst [vmem:[%s1573_s7] sm:$0xff] %v1076_v54  ;;  %v1038_v56 = vadd.f32 %v1225_v55, %v1171_v44 }
 0x2b0   :  { %v1079_v58 = vadd.f32 %v1247_v57, %v1038_v56 }
 0x2b2   :  { %1083 = vst [vmem:[%s1573_s7 + $0x8] sm:$0xff] %v1079_v58 }
 0x2b3   :  { %1088 = vsyncpa [#allocation3], 1 }
 0x2b4   :  { %1089 = vsyncpa [#allocation5], 1 }

</bundles_post_ra>
